<compile_context>
chip_gen: v6e
topology: v6e:2x2x1
jax: 0.10.0
libtpu: 0.0.40
codegen_flags: <defaults>
</compile_context>

<pallas_src>
import functools

import jax
import jax.numpy as jnp
from jax.experimental import pallas as pl
from jax.experimental.pallas import tpu as pltpu

_EPS = 1e-6          # matches torch F.pairwise_distance default eps
_MIN_ROWS = 16       # batch-tile granularity (sublane-safe for f32 and bf16)


def _l2dist_partial_kernel(o1_ref, o2_ref, label_ref, out_ref, *, total_rows):
    """One batch tile -> one f32 partial sum of squared (dist - label)."""
    bt = o1_ref.shape[0]

    # Tiles arrive in their native dtype; cast to f32 after load, accumulate in f32.
    o1 = o1_ref[...].astype(jnp.float32)
    o2 = o2_ref[...].astype(jnp.float32)

    diff = o1 - o2 + _EPS                                   # (bt, D)  VPU
    sq_sum = jnp.sum(diff * diff, axis=-1, keepdims=True)   # (bt, 1)  XLU reduce
    dist = jnp.sqrt(sq_sum)                                 # (bt, 1)  EUP
    err = dist - label_ref[...]                             # (bt, 1)

    # Mask rows of the (possibly partial) edge block: data beyond the true batch
    # size is undefined (Pallas pads the last block), so select it to zero before
    # reducing; the mean divides by the true B outside the kernel.
    row = jax.lax.broadcasted_iota(jnp.int32, (bt, 1), 0)
    valid = (pl.program_id(0) * bt + row) < total_rows
    sse = jnp.sum(jnp.where(valid, err * err, 0.0))

    out_ref[...] = sse.reshape(1, 1, 1)


def _choose_block_rows(n_rows, d, itemsize, *, vmem_budget_bytes, max_rows=1024):
    """Largest batch tile (multiple of _MIN_ROWS) whose double-buffered VMEM
    footprint stays under the budget (default budget is v7x-safe)."""
    d_pad = pl.cdiv(d, 128) * 128                  # lane-padded feature width in VMEM
    # two embedding inputs x 2 pipeline buffers + the (bt, 1) f32 label block
    per_row = 2 * 2 * d_pad * itemsize + 2 * 128 * 4
    bt = min(max_rows, max(_MIN_ROWS, vmem_budget_bytes // per_row))
    bt -= bt % _MIN_ROWS
    return max(_MIN_ROWS, int(bt))


def l2_dist_loss(output1, output2, label, *, block_rows=None,
                 vmem_budget_bytes=16 * 1024 * 1024, vmem_limit_bytes=None):
    """output1, output2: (B, D) floats (any float dtype); label: (B,) -> scalar f32."""
    B, D = output1.shape
    label2d = label.reshape(B, 1).astype(jnp.float32)   # tiny; keep f32

    # Only pad truly tiny batches up to one minimal tile; for B >= _MIN_ROWS the
    # partial edge block is handled by in-kernel masking (no array copies).
    padded_B = B
    if B < _MIN_ROWS:
        pad = _MIN_ROWS - B
        output1 = jnp.pad(output1, ((0, pad), (0, 0)))
        output2 = jnp.pad(output2, ((0, pad), (0, 0)))
        label2d = jnp.pad(label2d, ((0, pad), (0, 0)))
        padded_B = _MIN_ROWS

    itemsize = max(jnp.dtype(output1.dtype).itemsize,
                   jnp.dtype(output2.dtype).itemsize)
    if block_rows is None:
        block_rows = _choose_block_rows(padded_B, D, itemsize,
                                        vmem_budget_bytes=vmem_budget_bytes)
    assert block_rows % _MIN_ROWS == 0, "block_rows must be a multiple of 16"
    bt = min(block_rows, (padded_B // _MIN_ROWS) * _MIN_ROWS)  # block <= batch
    num_tiles = pl.cdiv(padded_B, bt)

    kernel = functools.partial(_l2dist_partial_kernel, total_rows=B)

    cp_kwargs = dict(dimension_semantics=("parallel",))
    if vmem_limit_bytes is not None:
        cp_kwargs["vmem_limit_bytes"] = vmem_limit_bytes

    partials = pl.pallas_call(
        kernel,
        out_shape=jax.ShapeDtypeStruct((num_tiles, 1, 1), jnp.float32),
        grid_spec=pltpu.PrefetchScalarGridSpec(
            num_scalar_prefetch=0,
            grid=(num_tiles,),
            in_specs=[
                pl.BlockSpec((bt, D), lambda i: (i, 0)),   # o1 tile (native dtype)
                pl.BlockSpec((bt, D), lambda i: (i, 0)),   # o2 tile (native dtype)
                pl.BlockSpec((bt, 1), lambda i: (i, 0)),   # label tile (f32)
            ],
            out_specs=pl.BlockSpec((1, 1, 1), lambda i: (i, 0, 0)),
        ),
        compiler_params=pltpu.CompilerParams(**cp_kwargs),
    )(output1, output2, label2d)

    # Finalize: tiny (num_tiles,) reduction + mean over the TRUE batch size.
    return jnp.sum(partials) / B


def _reference(output1, output2, label):
    """Pure-JAX reference (same f32 compute as the kernel)."""
    diff = output1.astype(jnp.float32) - output2.astype(jnp.float32) + _EPS
    dist = jnp.sqrt(jnp.sum(diff * diff, axis=-1))
    return jnp.mean((dist - label.astype(jnp.float32)) ** 2)


def l2_dist_loss_auto(output1, output2, label, *, min_elements=1 << 18):
    """Size-gated entry point: tiny problems are cheaper as fused XLA (per-grid-step
    overhead + DMA latency dominate); large ones use the Pallas kernel."""
    if output1.size < min_elements:
        return _reference(output1, output2, label)
    return l2_dist_loss(output1, output2, label)


if __name__ == "__main__":
    key = jax.random.PRNGKey(0)
    k1, k2, k3 = jax.random.split(key, 3)

    # Small siamese-embedding shapes; B=24 is deliberately NOT a multiple of the
    # 16-row tile so the multi-tile grid and masked partial edge block are exercised.
    B, D = 24, 32
    o1 = jax.random.normal(k1, (B, D), dtype=jnp.float32)
    o2 = jax.random.normal(k2, (B, D), dtype=jnp.float32)
    label = jax.random.uniform(k3, (B,), dtype=jnp.float32)

    loss = l2_dist_loss(o1, o2, label)
    jax.block_until_ready(loss)
    ref = _reference(o1, o2, label)
    assert jnp.allclose(loss, ref, rtol=1e-5, atol=1e-5), (loss, ref)

    # Native-dtype path: bf16 embeddings are DMA'd as bf16 (half the HBM traffic)
    # and cast to f32 inside the kernel.
    o1b, o2b = o1.astype(jnp.bfloat16), o2.astype(jnp.bfloat16)
    loss_bf16 = l2_dist_loss(o1b, o2b, label)
    jax.block_until_ready(loss_bf16)
    ref_bf16 = _reference(o1b, o2b, label)
    assert jnp.allclose(loss_bf16, ref_bf16, rtol=1e-3, atol=1e-3), (loss_bf16, ref_bf16)

    print("KERNEL_OK")
</pallas_src>

<mosaic_0001>
module attributes {stable_mosaic.version = 11 : i64} {
  func.func @_l2dist_partial_kernel(%arg0: i32, %arg1: memref<16x32xf32, #tpu.memory_space<vmem>>, %arg2: memref<16x32xf32, #tpu.memory_space<vmem>>, %arg3: memref<16x1xf32, #tpu.memory_space<vmem>>, %arg4: memref<1x1x1xf32, #tpu.memory_space<vmem>>) attributes {dimension_semantics = [#tpu.dimension_semantics<parallel>], iteration_bounds = array<i64: 2>, scalar_prefetch = 0 : i64, scratch_operands = 0 : i64, tpu.core_type = #tpu.core_type<tc>, window_params = [{transform_indices = @transform_0, window_bounds = array<i64: 16, 32>}, {transform_indices = @transform_1, window_bounds = array<i64: 16, 32>}, {transform_indices = @transform_2, window_bounds = array<i64: 16, 1>}, {transform_indices = @transform_3, window_bounds = array<i64: 1, 1, 1>}]} {
    %c0 = arith.constant 0 : index
    %c0_0 = arith.constant 0 : index
    %0 = vector.load %arg1[%c0, %c0_0] : memref<16x32xf32, #tpu.memory_space<vmem>>, vector<16x32xf32>
    %c0_1 = arith.constant 0 : index
    %c0_2 = arith.constant 0 : index
    %1 = vector.load %arg2[%c0_1, %c0_2] : memref<16x32xf32, #tpu.memory_space<vmem>>, vector<16x32xf32>
    %2 = arith.subf %0, %1 : vector<16x32xf32>
    %cst = arith.constant 9.99999997E-7 : f32
    %3 = vector.broadcast %cst : f32 to vector<16x32xf32>
    %4 = arith.addf %2, %3 : vector<16x32xf32>
    %5 = arith.mulf %4, %4 : vector<16x32xf32>
    %cst_3 = arith.constant dense<0.000000e+00> : vector<16xf32>
    %6 = vector.multi_reduction <add>, %5, %cst_3 [1] : vector<16x32xf32> to vector<16xf32>
    %7 = vector.shape_cast %6 : vector<16xf32> to vector<16x1xf32>
    %8 = math.sqrt %7 : vector<16x1xf32>
    %c0_4 = arith.constant 0 : index
    %c0_5 = arith.constant 0 : index
    %9 = vector.load %arg3[%c0_4, %c0_5] : memref<16x1xf32, #tpu.memory_space<vmem>>, vector<16x1xf32>
    %10 = arith.subf %8, %9 : vector<16x1xf32>
    %11 = tpu.iota {dimensions = array<i32: 0>} : vector<16x1xi32>
    %c16_i32 = arith.constant 16 : i32
    %12 = arith.muli %arg0, %c16_i32 : i32
    %13 = vector.broadcast %12 : i32 to vector<16x1xi32>
    %14 = arith.addi %13, %11 : vector<16x1xi32>
    %c24_i32 = arith.constant 24 : i32
    %15 = vector.broadcast %c24_i32 : i32 to vector<16x1xi32>
    %16 = arith.cmpi slt, %14, %15 : vector<16x1xi32>
    %17 = arith.mulf %10, %10 : vector<16x1xf32>
    %cst_6 = arith.constant 0.000000e+00 : f32
    %18 = vector.broadcast %cst_6 : f32 to vector<16x1xf32>
    %19 = arith.select %16, %17, %18 : vector<16x1xi1>, vector<16x1xf32>
    %20 = vector.shape_cast %19 : vector<16x1xf32> to vector<1x16x1xf32>
    %cst_7 = arith.constant dense<0.000000e+00> : vector<1xf32>
    %21 = vector.multi_reduction <add>, %20, %cst_7 [1, 2] : vector<1x16x1xf32> to vector<1xf32>
    %22 = vector.shape_cast %21 : vector<1xf32> to vector<1x1x1xf32>
    %23 = vector.extract %22[0, 0, 0] : f32 from vector<1x1x1xf32>
    %24 = vector.broadcast %23 : f32 to vector<1x1x1xf32>
    %c0_8 = arith.constant 0 : index
    %c0_9 = arith.constant 0 : index
    %c0_10 = arith.constant 0 : index
    %25 = vector.load %arg4[%c0_8, %c0_9, %c0_10] : memref<1x1x1xf32, #tpu.memory_space<vmem>>, vector<1x1x1xf32>
    tpu.vector_store %arg4[%c0_8, %c0_9, %c0_10], %24 {strides = array<i32>} : memref<1x1x1xf32, #tpu.memory_space<vmem>>, vector<1x1x1xf32>,
    return
  }
  func.func @transform_0(%arg0: i32) -> (i32, i32) {
    %c0_i32 = arith.constant 0 : i32
    %c0_i32_0 = arith.constant 0 : i32
    return %arg0, %c0_i32 : i32, i32
  }
  func.func @transform_1(%arg0: i32) -> (i32, i32) {
    %c0_i32 = arith.constant 0 : i32
    %c0_i32_0 = arith.constant 0 : i32
    return %arg0, %c0_i32 : i32, i32
  }
  func.func @transform_2(%arg0: i32) -> (i32, i32) {
    %c0_i32 = arith.constant 0 : i32
    %c0_i32_0 = arith.constant 0 : i32
    return %arg0, %c0_i32 : i32, i32
  }
  func.func @transform_3(%arg0: i32) -> (i32, i32, i32) {
    %c0_i32 = arith.constant 0 : i32
    %c0_i32_0 = arith.constant 0 : i32
    %c0_i32_1 = arith.constant 0 : i32
    return %arg0, %c0_i32, %c0_i32_0 : i32, i32, i32
  }
}

</mosaic_0001>

<bundles_post_ra>
// kernel: tpu_custom_call.1
= control target key start
LH: loop header
LB: loop body
LE: loop exit
PB: predicated region body
PF: predicated region fallthrough
CT: control target
= control target key end

     0   :  { %8 = vsyncpa [#allocation3], 0  ;;  %s689_s0 = inlined_call_operand.vmem [shape: f32[24,32], index: 0, kind: input, shape index: {}]   ;;  %s690_s1 = inlined_call_operand.hbm [shape: f32[24,32], index: 1, kind: input, shape index: {}]   ;;  %s691_s2 = inlined_call_operand.vmem [shape: f32[24,1], index: 2, kind: input, shape index: {}]   ;;  %s692_s3 = inlined_call_operand.vmem [shape: f32[2,1,1], index: 3, kind: output, shape index: {}]  }
   0x1   :  { %10 = vsyncpa [#allocation3 + $0x1], 0  ;;  %s575_s12 = smov 0   ;;  %s577_s13 = smov 0  }
   0x2   :  { %s579_s14 = smov 0   ;;  %s581_s15 = smov 0  }
   0x3 LB: > { %s594_s16 = sadd.s32 4294967295, %s550_s15   ;;  %s597_s17 = sadd.s32 1, %s550_s15   ;;  %s550_s15 = sphi %s581_s15, %s697_s15   ;;  %s546_s14 = sphi %s579_s14, %s696_s14   ;;  %s542_s13 = sphi %s577_s13, %s695_s13   ;;  %s538_s12 = sphi %s575_s12, %s694_s12  }
   0x4   : > { %s46_s18 = ssub.s32 %s550_s15, %s597_s17  ;;  %s49_s19 = sadd.s32 1, %s546_s14 }
   0x5   : > { %p47_p0 = scmp.eq.s32.totalorder %s46_s18, 0  ;;  %p56_p1 = scmp.ne.s32.totalorder %s546_s14, %s542_s13 }
   0x6   : > { %p57_p2 = scmp.eq.s32.totalorder %s550_s15, 0  ;;  %p62_p3 = scmp.ne.s32.totalorder %s542_s13, %s538_s12 }
   0x7   : > { %s607_s20 = scalar_select %p47_p0, %s546_s14, %s49_s19  }
   0x8   : > { %p58_p4 = por %p57_p2, %p56_p1  ;;  %p63_p5 = scmp.eq.s32.totalorder %s594_s16, 0 }
   0x9   : > { %p431_p7 = scmp.ge.s32.totalorder %s550_s15, 2 }
   0xa   : > { %p610_p6 = por %p63_p5, %p62_p3 }
   0xb   : > { %134 = sbr.rel (%p431_p7) target bundleno = 48 (0x30), region = 16 }
  0x10   : > { %154 = sbr.rel (!%p58_p4) target bundleno = 48 (0x30), region = 24  ;;  %s155_s22 = sand.u32 (%p58_p4), 1, %s546_s14  }
  0x11   : > { %s433_s23 = sshll.u32 (%p58_p4), %s550_s15, 1  ;;  %s432_s24 = sshll.u32 (%p58_p4), %s155_s22, 4 }
  0x12   : > { %s161_s25 = ssub.s32 (%p58_p4), 3, %s433_s23  ;;  %s620_s28 = scalar_lea.sflag (%p58_p4), [#allocation3], %s155_s22 }
  0x13   : > { %p162_p8 = scmp.lt.s32.totalorder (%p58_p4), %s161_s25, 2  ;;  %s159_s29 = scalar_lea.vmem (%p58_p4), [#allocation2], %s432_s24 }
  0x15   : > { %s699_s25 = smov (!%p162_p8, %s161_s25), 2 }
  0x16   : > { %s617_s26 = sshll.u32 %s699_s25, 7 }
  0x17   : > { %s166_s27 = ssub.s32 256, %s617_s26 }
  0x18   : > { %167 = vsyncadd %s620_s28, %s166_s27  ;;  %p435_p9 = scmp.ne.s32.totalorder %s617_s26, 0  ;;  %s448_s30 = sshll.u32 %s550_s15, 8 }
  0x19   : > { %s628_s6 = scalar_lea.hbm %s690_s1, %s448_s30  ;;  %s172_s7 = sshll.u32 %s159_s29, 4  ;;  %s630_s7 = int_to_ptr.vmem [resolvable:$true] %s172_s7 }
  0x1a   : > { %s490_s8 = scalar_lea.hbm %s628_s6, %s617_s26  ;;  %s494_s11 = scalar_lea.hbm %s690_s1, 384 }
  0x1b   : > { %p491_p10 = scmp.ne.s32.totalorder %s628_s6, %s490_s8  ;;  %p495_p13 = scmp.lt.s32.totalorder %s628_s6, %s690_s1 }
  0x1c   : > { %p496_p0 = scmp.lt.s32.totalorder %s494_s11, %s490_s8 }
  0x1d   : > { %p492_p11 = pnand %p491_p10, %p435_p9 }
  0x1e   : > { %p497_p1 = por %p496_p0, %p495_p13 }
  0x1f   : > { %p493_p12 = pneg %p492_p11 }
  0x21   : > { %p498_p2 = pnand %p497_p1, %p493_p12 }
  0x23   : > { %501 = shalt.err (!%p498_p2)
}
  0x24   : > { %s502_s19 = scalar_lea.vmem %s630_s7, %s617_s26  ;;  %s552_s22 = smov [#allocation2]  }
  0x25   : > { %p503_p3 = scmp.ne.s32.totalorder %s630_s7, %s502_s19  ;;  %s506_s23 = sshll.u32 %s552_s22, 4  ;;  %s507_s23 = int_to_ptr.vmem [resolvable:$false] %s506_s23 }
  0x26   : > { %s508_s24 = scalar_lea.vmem %s507_s23, 512  ;;  %p509_p7 = scmp.lt.s32.totalorder %s630_s7, %s507_s23 }
  0x27   : > { %p504_p4 = pnand %p503_p3, %p435_p9  ;;  %p510_p8 = scmp.lt.s32.totalorder %s508_s24, %s502_s19 }
  0x29   : > { %p505_p5 = pneg %p504_p4  ;;  %p511_p10 = por %p510_p8, %p509_p7 }
  0x2b   : > { %p512_p11 = pnand %p511_p10, %p505_p5 }
  0x2d   : > { %515 = shalt.err (!%p512_p11)
}
  0x2e   : > { %s553_s25 = smov 128   ;;  %s554_s27 = smov 8  }
  0x2f   : > { %178 = dma.hbm_to_vmem [thread:$0]  (%p435_p9), %s628_s6, %s617_s26, %s630_s7, %s620_s28, %s553_s25, %s553_s25, %s554_s27  }
  0x30 PF: > { %p439_p12 = scmp.ge.s32.totalorder %s550_s15, 1  ;;  %p197_p13 = scmp.lt.s32.totalorder %s550_s15, 3 }
  0x32   : > { %p198_p0 = pnand %p439_p12, %p197_p13 }
  0x33   : > { %s203_s29 = sand.u32 (!%p198_p0), 1, %s542_s13  }
  0x34   : > { %201 = sbr.rel (%p198_p0) target bundleno = 442 (0x1ba), region = 32  ;;  %s440_s30 = sshll.u32 (!%p198_p0), %s203_s29, 4 }
  0x35   : > { %s204_s4 = scalar_lea.sflag (!%p198_p0), [#allocation3], %s203_s29  ;;  %s207_s5 = scalar_lea.vmem (!%p198_p0), [#allocation2], %s440_s30 }
  0x39   : > { %533 = dma.done.wait (%p610_p6), %s204_s4, 256  }
  0x3a   : > { %535 = vsyncadd (%p610_p6), %s204_s4, 4294967040  ;;  %s441_s26 = sshll.u32 %s594_s16, 1  ;;  %v284_v1 = vld [vmem:[%s207_s5] sm:$0xff]  ;;  %v285_v4 = vld [vmem:[%s207_s5 + $0x8] sm:$0xff]  ;;  %vm292_vm0 = vcmask 261120   ;;  %v317_v14 = vlaneseq  ;;  %s445_s21 = sshll.u32 %s594_s16, 4 }
  0x3b   : > { %p251_p9 = scmp.lt.s32.totalorder %s441_s26, 2  ;;  %v321_v18 = vstv %s445_s21  ;;  %vm330_vm7 = vcmask 7168   ;;  %p279_p6 = scmp.lt.s32.totalorder %s594_s16, 1  ;;  %vm344_vm8 = vcmask 0  }
  0x3c   : > { %v318_v16 = vshrl.u32 %v317_v14, 7 }
  0x3d   : > { %s701_s26 = smov (!%p251_p9, %s441_s26), 2  ;;  %s703_s16 = smov (!%p279_p6, %s594_s16), 1 }
  0x3e   : > { %s442_s28 = sshll.u32 %s701_s26, 3  ;;  %v319_v21 = vadd.s32 8, %v318_v16  ;;  %v322_v25 = vadd.s32 %v321_v18, %v318_v16  ;;  %s281_s18 = scalar_lea.vmem %s692_s3, %s703_s16 }
  0x3f   : > { %s254_s7 = scalar_lea.vmem %s689_s0, %s442_s28  ;;  %s273_s10 = scalar_lea.vmem %s691_s2, %s442_s28 }
  0x40   : > { %v282_v0 = vld [vmem:[%s254_s7] sm:$0xff]  ;;  %v283_v2 = vld [vmem:[%s254_s7 + $0x8] sm:$0xff]  ;;  %v323_v30 = vadd.s32 %v321_v18, %v319_v21  ;;  %vm324_vm5 = vcmp.lt.s32.totalorder %v322_v25, 24 }
  0x41   : > { %v286_v3 = vsub.f32 %v282_v0, %v284_v1  ;;  %v287_v5 = vsub.f32 %v283_v2, %v285_v4  ;;  %v313_v20 = vld [vmem:[%s273_s10] sm:$0xff]  ;;  %v314_v29 = vld [vmem:[%s273_s10 + $0x8] sm:$0xff] }
  0x42   : > { %vm325_vm6 = vcmp.lt.s32.totalorder %v323_v30, 24 }
  0x43   : > { %v288_v6 = vadd.f32 1e-06, %v286_v3  ;;  %v289_v7 = vadd.f32 1e-06, %v287_v5 }
  0x45   : > { %v290_v8 = vmul.f32 %v288_v6, %v288_v6  ;;  %v291_v9 = vmul.f32 %v289_v7, %v289_v7 }
  0x47   : > { %v293_v10 = vsel %vm292_vm0, %v290_v8, 0.0  ;;  %v296_v11 = vsel %vm292_vm0, %v291_v9, 0.0 }
  0x48   : > { %294 = vadd.xlane.f32.xlu0 %v293_v10 }
  0x4c   : > { %297 = vadd.xlane.f32.xlu0 %v296_v11 }
  0xd1   : > { %v295_v12 = vpop.xlane.xlu0 %294 }
  0xd2   : > { %486 = vrsqrt.f32 %v295_v12  ;;  %vm301_vm1 = vcmp.eq.f32.partialorder %v295_v12, inf  ;;  %v304_v19 = vand.u32 2147483648, %v295_v12  ;;  %vm303_vm2 = vcmp.eq.f32.partialorder %v295_v12, 0.0 }
  0xd5   : > { %v298_v13 = vpop.xlane.xlu0 %297 }
  0xd6   : > { %488 = vrsqrt.f32 %v298_v13  ;;  %vm308_vm3 = vcmp.eq.f32.partialorder %v298_v13, inf  ;;  %v311_v28 = vand.u32 2147483648, %v298_v13  ;;  %vm310_vm4 = vcmp.eq.f32.partialorder %v298_v13, 0.0 }
  0xdf   : > { %v487_v15 = vpop.eup %486 }
  0xe0   : > { %v300_v17 = vmul.f32 %v487_v15, %v295_v12 }
  0xe2   : > { %v302_v22 = vsel %vm301_vm1, %v295_v12, %v300_v17 }
  0xe3   : > { %v489_v23 = vpop.eup %488  ;;  %v305_v24 = vsel %vm303_vm2, %v304_v19, %v302_v22 }
  0xe4   : > { %v307_v26 = vmul.f32 %v489_v23, %v298_v13  ;;  %v315_v27 = vsub.f32 %v305_v24, %v313_v20 }
  0xe6   : > { %v309_v31 = vsel %vm308_vm3, %v298_v13, %v307_v26  ;;  %v326_v32 = vmul.f32 %v315_v27, %v315_v27 }
  0xe7   : > { %v312_v33 = vsel %vm310_vm4, %v311_v28, %v309_v31 }
  0xe8   : > { %v316_v34 = vsub.f32 %v312_v33, %v314_v29  ;;  %v328_v36 = vsel %vm324_vm5, %v326_v32, 0.0 }
  0xe9   : > { %v331_v38 = vsel %vm330_vm7, %v328_v36, 0.0 }
  0xea   : > { %v327_v35 = vmul.f32 %v316_v34, %v316_v34 }
  0xec   : > { %v329_v37 = vsel %vm325_vm6, %v327_v35, 0.0 }
  0xed   : > { %v332_v39 = vsel %vm330_vm7, %v329_v37, 0.0 }
  0xee   : > { %v333_v40 = vadd.f32 %v332_v39, %v331_v38 }
  0xf0   : > { %334 = vadd.xlane.f32.xlu1 %v333_v40 }
 0x179   : > { %v335_v41 = vpop.xlane.xlu1 %334 }
 0x17a   : > { %v336_v42 = vrot.slane %v335_v41, 4 }
 0x17c   : > { %v337_v43 = vadd.f32 %v336_v42, %v335_v41 }
 0x17e   : > { %v338_v44 = vrot.slane %v337_v43, 2 }
 0x180   : > { %v339_v45 = vadd.f32 %v338_v44, %v337_v43 }
 0x182   : > { %v340_v46 = vrot.slane %v339_v45, 1 }
 0x184   : > { %v341_v47 = vadd.f32 %v340_v46, %v339_v45 }
 0x186   : > { %449 = vpush %v341_v47 }
 0x1b7   : > { %s450_s19 = spop %449 }
 0x1b8   : > { %v343_v48 = vstv %s450_s19 }
 0x1b9   : > { %345 = vst.msk [vmem:[%s281_s18] sm:$0x1] %vm344_vm8, %v343_v48 }
 0x1ba PF: > { %p13_p1 = scmp.ge.s32.totalorder %s597_s17, 4   ;;  %s694_s12 = smov %s542_s13 }
 0x1bb   : > { %s695_s13 = smov %s546_s14  ;;  %s696_s14 = smov %s607_s20 }
 0x1bc   : > { %s697_s15 = smov %s597_s17  ;;  %15 = sbr.rel (!%p13_p1) target bundleno = 3 (0x3), region = 78 }
 0x1c1   :  { %363 = vsyncpa [#allocation3], 1 }
 0x1c2   :  { %365 = vsyncpa [#allocation3 + $0x1], 1 }

</bundles_post_ra>
